<compile_context>
chip_gen: v5e
topology: v5e:2x2
jax: 0.10.0
libtpu: 0.0.40
codegen_flags: <defaults>
</compile_context>

<pallas_src>
import numpy as np
import jax
import jax.numpy as jnp
from jax.experimental import pallas as pl
from jax.experimental.pallas import tpu as pltpu


def _round_up(n, m):
    return ((n + m - 1) // m) * m


def _tpu_generation():
    try:
        kind = jax.devices()[0].device_kind.lower()
    except Exception:
        return "v6e"
    if "v5 lite" in kind or "v5e" in kind or "v5lite" in kind:
        return "v5e"
    if "v7" in kind:
        return "v7x"
    if "v6" in kind or "trillium" in kind:
        return "v6e"
    return "v6e"


# Per-generation tile config: tm (row tile), tf (d_ffwd tile), VMEM limit.
_TILE_CONFIG = {
    "v5e": dict(tm=256, tf=256, vmem=64 * 1024 * 1024),
    "v6e": dict(tm=512, tf=1024, vmem=96 * 1024 * 1024),
    "v7x": dict(tm=384, tf=512, vmem=52 * 1024 * 1024),
}


def _pad_cast_2d(a, rows, cols, dtype):
    if a.dtype != dtype:
        a = a.astype(dtype)
    r, c = a.shape
    if (r, c) == (rows, cols):
        return a
    return jnp.zeros((rows, cols), dtype).at[:r, :c].set(a)


# ---------------------------------------------------------------------------
# Kernels
# ---------------------------------------------------------------------------

def _ffw_kernel_acc_out(x_ref, w1_ref, b1_ref, w2_ref, b2_ref, o_ref):
    """f32 output: accumulate directly into the resident o_ref block."""
    j = pl.program_id(1)

    h = jnp.dot(x_ref[...], w1_ref[...], preferred_element_type=jnp.float32)
    h = jnp.maximum(h + b1_ref[...], 0.0)
    contrib = jnp.dot(h.astype(w2_ref.dtype), w2_ref[...],
                      preferred_element_type=jnp.float32)

    @pl.when(j == 0)
    def _init():
        o_ref[...] = contrib

    @pl.when(j != 0)
    def _accum():
        o_ref[...] += contrib

    @pl.when(j == pl.num_programs(1) - 1)
    def _finalize():
        o_ref[...] += b2_ref[...]


def _ffw_kernel_scratch(x_ref, w1_ref, b1_ref, w2_ref, b2_ref, o_ref, acc_ref):
    """Non-f32 output: f32 VMEM scratch accumulator, cast on finalize."""
    j = pl.program_id(1)

    @pl.when(j == 0)
    def _init():
        acc_ref[...] = jnp.zeros_like(acc_ref)

    h = jnp.dot(x_ref[...], w1_ref[...], preferred_element_type=jnp.float32)
    h = jnp.maximum(h + b1_ref[...], 0.0)
    acc_ref[...] += jnp.dot(h.astype(w2_ref.dtype), w2_ref[...],
                            preferred_element_type=jnp.float32)

    @pl.when(j == pl.num_programs(1) - 1)
    def _finalize():
        o_ref[...] = (acc_ref[...] + b2_ref[...]).astype(o_ref.dtype)


# ---------------------------------------------------------------------------
# Host-side wrappers
# ---------------------------------------------------------------------------

def ffw_prepare_params(w1, b1, w2, b2, *, tf=None,
                       compute_dtype=jnp.bfloat16, gen=None):
    """Pad + cast weights ONCE (call at init, reuse across forward calls).

    w1: (d_model, d_ffwd), b1: (d_ffwd,), w2: (d_ffwd, d_model), b2: (d_model,).
    """
    gen = gen or _tpu_generation()
    cfg = _TILE_CONFIG[gen]
    d_model, d_ffwd = w1.shape

    if tf is None:
        tf = cfg["tf"]
    tf = _round_up(min(tf, _round_up(d_ffwd, 128)), 128)

    d_model_p = _round_up(d_model, 128)
    d_ffwd_p = _round_up(d_ffwd, tf)

    return dict(
        w1=_pad_cast_2d(w1, d_model_p, d_ffwd_p, compute_dtype),
        b1=_pad_cast_2d(b1.reshape(1, -1), 1, d_ffwd_p, jnp.float32),
        w2=_pad_cast_2d(w2, d_ffwd_p, d_model_p, compute_dtype),
        b2=_pad_cast_2d(b2.reshape(1, -1), 1, d_model_p, jnp.float32),
        d_model=d_model, d_ffwd=d_ffwd,
        d_model_p=d_model_p, d_ffwd_p=d_ffwd_p,
        tf=tf, gen=gen, compute_dtype=compute_dtype,
    )


def ffw_forward(x, params, *, tm=None, out_dtype=None):
    """x: (batch, seq, d_model). params: output of ffw_prepare_params.

    Computes relu(x @ W1 + b1) @ W2 + b2 with bf16 MXU inputs and f32
    accumulation. Result sliced back to the original (batch, seq, d_model).
    """
    batch, seq, d_model = x.shape
    assert d_model == params["d_model"], "d_model mismatch vs prepared params"
    gen = params["gen"]
    cfg = _TILE_CONFIG[gen]
    compute_dtype = params["compute_dtype"]
    d_model_p = params["d_model_p"]
    d_ffwd_p = params["d_ffwd_p"]
    tf = params["tf"]
    out_dtype = x.dtype if out_dtype is None else out_dtype

    M = batch * seq

    # Row tile: generation default, clamped to M (sublane multiple of 16).
    if tm is None:
        tm = cfg["tm"]
    tm = _round_up(min(tm, _round_up(M, 16)), 16)
    # v7x: make sure the "parallel" i axis has >= 2 blocks (2 TensorCores).
    if gen == "v7x" and M > 16:
        tm = min(tm, _round_up(max(16, -(-M // 2)), 16))
    M_p = _round_up(M, tm)

    # Per-call activation cast (+ pad only when shapes are not aligned).
    x2d = x.reshape(M, d_model).astype(compute_dtype)
    if (M_p, d_model_p) != (M, d_model):
        x2d = jnp.zeros((M_p, d_model_p), compute_dtype).at[:M, :d_model].set(x2d)

    grid = (M_p // tm, d_ffwd_p // tf)

    in_specs = [
        pl.BlockSpec((tm, d_model_p), lambda i, j: (i, 0)),   # x rows (resident over j)
        pl.BlockSpec((d_model_p, tf), lambda i, j: (0, j)),   # W1 column panel
        pl.BlockSpec((1, tf), lambda i, j: (0, j)),           # b1 panel
        pl.BlockSpec((tf, d_model_p), lambda i, j: (j, 0)),   # W2 row panel
        pl.BlockSpec((1, d_model_p), lambda i, j: (0, 0)),    # b2
    ]
    out_spec = pl.BlockSpec((tm, d_model_p), lambda i, j: (i, 0))

    if np.dtype(out_dtype) == np.dtype(np.float32):
        kernel = _ffw_kernel_acc_out
        scratch = []
    else:
        kernel = _ffw_kernel_scratch
        scratch = [pltpu.VMEM((tm, d_model_p), jnp.float32)]

    out = pl.pallas_call(
        kernel,
        out_shape=jax.ShapeDtypeStruct((M_p, d_model_p), out_dtype),
        grid_spec=pltpu.PrefetchScalarGridSpec(
            num_scalar_prefetch=0,
            grid=grid,
            in_specs=in_specs,
            out_specs=out_spec,
            scratch_shapes=scratch,
        ),
        compiler_params=pltpu.CompilerParams(
            dimension_semantics=("parallel", "arbitrary"),
            vmem_limit_bytes=cfg["vmem"],
        ),
    )(x2d, params["w1"], params["b1"], params["w2"], params["b2"])

    if (M_p, d_model_p) != (M, d_model):
        out = out[:M, :d_model]
    return out.reshape(batch, seq, d_model)


def init_params(key, d_model, d_ffwd, dtype=jnp.float32):
    """Deterministic init matching torch.nn.Linear shapes.
    PyTorch ffwd_1.weight: (d_ffwd, d_model) -> stored transposed (d_model, d_ffwd).
    PyTorch ffwd_2.weight: (d_model, d_ffwd) -> stored transposed (d_ffwd, d_model)."""
    k1, k2, k3, k4 = jax.random.split(key, 4)
    bound1 = 1.0 / (d_model ** 0.5)
    bound2 = 1.0 / (d_ffwd ** 0.5)
    w1 = jax.random.uniform(k1, (d_model, d_ffwd), dtype, -bound1, bound1)
    b1 = jax.random.uniform(k2, (d_ffwd,), dtype, -bound1, bound1)
    w2 = jax.random.uniform(k3, (d_ffwd, d_model), dtype, -bound2, bound2)
    b2 = jax.random.uniform(k4, (d_model,), dtype, -bound2, bound2)
    return w1, b1, w2, b2


if __name__ == "__main__":
    d_model = 32
    d_ffwd = 128
    batch, seq = 2, 8

    key = jax.random.PRNGKey(0)
    kx, kp = jax.random.split(key)
    x = jax.random.normal(kx, (batch, seq, d_model), dtype=jnp.float32)
    w1, b1, w2, b2 = init_params(kp, d_model, d_ffwd)

    # Weights padded/cast once; reused across forward calls.
    params = ffw_prepare_params(w1, b1, w2, b2)

    y = ffw_forward(x, params)
    y = jax.block_until_ready(y)

    # Reference in plain JAX, mirroring the kernel's bf16-input / f32-accumulate
    # numerics (same math as the PyTorch module, with bf16-cast operands).
    xb = x.astype(jnp.bfloat16).astype(jnp.float32)
    w1b = w1.astype(jnp.bfloat16).astype(jnp.float32)
    w2b = w2.astype(jnp.bfloat16).astype(jnp.float32)
    h = jnp.maximum(xb @ w1b + b1.astype(jnp.float32), 0.0)
    hb = h.astype(jnp.bfloat16).astype(jnp.float32)
    ref = hb @ w2b + b2.astype(jnp.float32)
    assert jnp.allclose(y, ref, atol=2e-2, rtol=2e-2), "mismatch vs reference"

    print("KERNEL_OK")
</pallas_src>

<mosaic_0001>
module attributes {stable_mosaic.version = 11 : i64} {
  func.func @_ffw_kernel_acc_out(%arg0: i32, %arg1: i32, %arg2: memref<16x128xbf16, #tpu.memory_space<vmem>>, %arg3: memref<128x128xbf16, #tpu.memory_space<vmem>>, %arg4: memref<1x128xf32, #tpu.memory_space<vmem>>, %arg5: memref<128x128xbf16, #tpu.memory_space<vmem>>, %arg6: memref<1x128xf32, #tpu.memory_space<vmem>>, %arg7: memref<16x128xf32, #tpu.memory_space<vmem>>) attributes {dimension_semantics = [#tpu.dimension_semantics<parallel>, #tpu.dimension_semantics<arbitrary>], iteration_bounds = array<i64: 1, 1>, scalar_prefetch = 0 : i64, scratch_operands = 0 : i64, tpu.core_type = #tpu.core_type<tc>, window_params = [{transform_indices = @transform_0, window_bounds = array<i64: 16, 128>}, {transform_indices = @transform_1, window_bounds = array<i64: 128, 128>}, {transform_indices = @transform_2, window_bounds = array<i64: 1, 128>}, {transform_indices = @transform_3, window_bounds = array<i64: 128, 128>}, {pipeline_mode = #tpu.pipeline_mode<synchronous>, transform_indices = @transform_4, window_bounds = array<i64: 1, 128>}, {transform_indices = @transform_5, window_bounds = array<i64: 16, 128>}]} {
    %c0 = arith.constant 0 : index
    %c0_0 = arith.constant 0 : index
    %0 = vector.load %arg2[%c0, %c0_0] : memref<16x128xbf16, #tpu.memory_space<vmem>>, vector<16x128xbf16>
    %c0_1 = arith.constant 0 : index
    %c0_2 = arith.constant 0 : index
    %1 = vector.load %arg3[%c0_1, %c0_2] : memref<128x128xbf16, #tpu.memory_space<vmem>>, vector<128x128xbf16>
    %cst = arith.constant dense<0.000000e+00> : vector<16x128xf32>
    %2 = tpu.matmul %0, %1, %cst {dimension_numbers = #tpu.dot_dimension_numbers<[1], [0], [0], [1], [0, 0, 1, 1], [], []>} : vector<16x128xbf16>, vector<128x128xbf16>, vector<16x128xf32> -> vector<16x128xf32>
    %c0_3 = arith.constant 0 : index
    %c0_4 = arith.constant 0 : index
    %3 = vector.load %arg4[%c0_3, %c0_4] : memref<1x128xf32, #tpu.memory_space<vmem>>, vector<1x128xf32>
    %4 = vector.broadcast %3 : vector<1x128xf32> to vector<16x128xf32>
    %5 = arith.addf %2, %4 : vector<16x128xf32>
    %cst_5 = arith.constant 0.000000e+00 : f32
    %6 = vector.broadcast %cst_5 : f32 to vector<16x128xf32>
    %7 = arith.maximumf %5, %6 : vector<16x128xf32>
    %8 = arith.truncf %7 : vector<16x128xf32> to vector<16x128xbf16>
    %c0_6 = arith.constant 0 : index
    %c0_7 = arith.constant 0 : index
    %9 = vector.load %arg5[%c0_6, %c0_7] : memref<128x128xbf16, #tpu.memory_space<vmem>>, vector<128x128xbf16>
    %cst_8 = arith.constant dense<0.000000e+00> : vector<16x128xf32>
    %10 = tpu.matmul %8, %9, %cst_8 {dimension_numbers = #tpu.dot_dimension_numbers<[1], [0], [0], [1], [0, 0, 1, 1], [], []>} : vector<16x128xbf16>, vector<128x128xbf16>, vector<16x128xf32> -> vector<16x128xf32>
    %c0_i32 = arith.constant 0 : i32
    %11 = arith.cmpi eq, %arg1, %c0_i32 : i32
    %12 = arith.extui %11 : i1 to i32
    %c0_i32_9 = arith.constant 0 : i32
    %13 = arith.cmpi ne, %12, %c0_i32_9 : i32
    scf.if %13 {
      %c0_14 = arith.constant 0 : index
      %c0_15 = arith.constant 0 : index
      %20 = vector.load %arg7[%c0_14, %c0_15] : memref<16x128xf32, #tpu.memory_space<vmem>>, vector<16x128xf32>
      tpu.vector_store %arg7[%c0_14, %c0_15], %10 {strides = array<i32>} : memref<16x128xf32, #tpu.memory_space<vmem>>, vector<16x128xf32>,
    } else {
    }
    %c0_i32_10 = arith.constant 0 : i32
    %14 = arith.cmpi ne, %arg1, %c0_i32_10 : i32
    %15 = arith.extui %14 : i1 to i32
    %c0_i32_11 = arith.constant 0 : i32
    %16 = arith.cmpi ne, %15, %c0_i32_11 : i32
    scf.if %16 {
      %c0_14 = arith.constant 0 : index
      %c0_15 = arith.constant 0 : index
      %20 = vector.load %arg7[%c0_14, %c0_15] : memref<16x128xf32, #tpu.memory_space<vmem>>, vector<16x128xf32>
      %21 = arith.addf %20, %10 : vector<16x128xf32>
      %c0_16 = arith.constant 0 : index
      %c0_17 = arith.constant 0 : index
      %22 = vector.load %arg7[%c0_16, %c0_17] : memref<16x128xf32, #tpu.memory_space<vmem>>, vector<16x128xf32>
      tpu.vector_store %arg7[%c0_16, %c0_17], %21 {strides = array<i32>} : memref<16x128xf32, #tpu.memory_space<vmem>>, vector<16x128xf32>,
    } else {
    }
    %c0_i32_12 = arith.constant 0 : i32
    %17 = arith.cmpi eq, %arg1, %c0_i32_12 : i32
    %18 = arith.extui %17 : i1 to i32
    %c0_i32_13 = arith.constant 0 : i32
    %19 = arith.cmpi ne, %18, %c0_i32_13 : i32
    scf.if %19 {
      %c0_14 = arith.constant 0 : index
      %c0_15 = arith.constant 0 : index
      %20 = vector.load %arg7[%c0_14, %c0_15] : memref<16x128xf32, #tpu.memory_space<vmem>>, vector<16x128xf32>
      %c0_16 = arith.constant 0 : index
      %c0_17 = arith.constant 0 : index
      %21 = vector.load %arg6[%c0_16, %c0_17] : memref<1x128xf32, #tpu.memory_space<vmem>>, vector<1x128xf32>
      %22 = vector.broadcast %21 : vector<1x128xf32> to vector<16x128xf32>
      %23 = arith.addf %20, %22 : vector<16x128xf32>
      %c0_18 = arith.constant 0 : index
      %c0_19 = arith.constant 0 : index
      %24 = vector.load %arg7[%c0_18, %c0_19] : memref<16x128xf32, #tpu.memory_space<vmem>>, vector<16x128xf32>
      tpu.vector_store %arg7[%c0_18, %c0_19], %23 {strides = array<i32>} : memref<16x128xf32, #tpu.memory_space<vmem>>, vector<16x128xf32>,
    } else {
    }
    return
  }
  func.func @transform_0(%arg0: i32, %arg1: i32) -> (i32, i32) {
    %c0_i32 = arith.constant 0 : i32
    %c0_i32_0 = arith.constant 0 : i32
    return %arg0, %c0_i32 : i32, i32
  }
  func.func @transform_1(%arg0: i32, %arg1: i32) -> (i32, i32) {
    %c0_i32 = arith.constant 0 : i32
    %c0_i32_0 = arith.constant 0 : i32
    return %c0_i32, %arg1 : i32, i32
  }
  func.func @transform_2(%arg0: i32, %arg1: i32) -> (i32, i32) {
    %c0_i32 = arith.constant 0 : i32
    %c0_i32_0 = arith.constant 0 : i32
    return %c0_i32, %arg1 : i32, i32
  }
  func.func @transform_3(%arg0: i32, %arg1: i32) -> (i32, i32) {
    %c0_i32 = arith.constant 0 : i32
    %c0_i32_0 = arith.constant 0 : i32
    return %arg1, %c0_i32 : i32, i32
  }
  func.func @transform_4(%arg0: i32, %arg1: i32) -> (i32, i32) {
    %c0_i32 = arith.constant 0 : i32
    %c0_i32_0 = arith.constant 0 : i32
    %c0_i32_1 = arith.constant 0 : i32
    return %c0_i32, %c0_i32_0 : i32, i32
  }
  func.func @transform_5(%arg0: i32, %arg1: i32) -> (i32, i32) {
    %c0_i32 = arith.constant 0 : i32
    %c0_i32_0 = arith.constant 0 : i32
    return %arg0, %c0_i32 : i32, i32
  }
}

</mosaic_0001>

<bundles_post_ra>
// kernel: tpu_custom_call.1
= control target key start
LH: loop header
LB: loop body
LE: loop exit
PB: predicated region body
PF: predicated region fallthrough
CT: control target
= control target key end

     0   :  { %10 = vsyncpa [#allocation3], 0  ;;  %s541_s0 = inlined_call_operand.hbm [shape: bf16[16,128], index: 0, kind: input, shape index: {}]   ;;  %s542_s1 = inlined_call_operand.hbm [shape: bf16[128,128], index: 1, kind: input, shape index: {}]   ;;  %s543_s2 = inlined_call_operand.vmem [shape: f32[1,128], index: 2, kind: input, shape index: {}]   ;;  %s544_s3 = inlined_call_operand.hbm [shape: bf16[128,128], index: 3, kind: input, shape index: {}]   ;;  %s545_s4 = inlined_call_operand.vmem [shape: f32[1,128], index: 4, kind: input, shape index: {}]   ;;  %s546_s5 = inlined_call_operand.hbm [shape: f32[16,128], index: 5, kind: output, shape index: {}]  }
   0x1   :  { %11 = vsyncpa [#allocation6], 0 }
   0x2   :  { %12 = vsyncpa [#allocation4], 0  ;;  %s30_s20 = sshll.u32 %s542_s1, 4  ;;  %s485_s21 = smov [#allocation5]   ;;  %s31_s20 = int_to_ptr.hbm [resolvable:$true] %s30_s20 }
   0x3   :  { %s32_s22 = sshll.u32 %s485_s21, 4  ;;  %s17_s25 = sshll.u32 %s541_s0, 4  ;;  %s33_s22 = int_to_ptr.vmem [resolvable:$true] %s32_s22  ;;  %s18_s25 = int_to_ptr.hbm [resolvable:$true] %s17_s25 }
   0x4   :  { %s486_s26 = smov 64   ;;  %s487_s27 = smov 4  }
   0x5   :  { %38 = dma.hbm_to_vmem [thread:$0]  %s31_s20, 1024, %s33_s22, [#allocation6], %s486_s26, %s486_s26, %s487_s27  }
   0x6   :  { %s488_s28 = smov [#allocation2]   ;;  %s45_s7 = sshll.u32 %s544_s3, 4  ;;  %s46_s7 = int_to_ptr.hbm [resolvable:$true] %s45_s7 }
   0x7   :  { %s19_s29 = sshll.u32 %s488_s28, 4  ;;  %s489_s1 = smov [#allocation7]   ;;  %s20_s29 = int_to_ptr.vmem [resolvable:$true] %s19_s29 }
   0x8   :  { %25 = dma.hbm_to_vmem [thread:$0]  %s18_s25, 128, %s20_s29, [#allocation3], %s486_s26, %s486_s26, %s487_s27  }
   0x9   :  { %s47_s8 = sshll.u32 %s489_s1, 4  ;;  %s48_s8 = int_to_ptr.vmem [resolvable:$true] %s47_s8 }
   0xa   :  { %53 = dma.hbm_to_vmem [thread:$0]  %s46_s7, 1024, %s48_s8, [#allocation6], %s486_s26, %s486_s26, %s487_s27  }
   0xb   :  { %479 = dma.done.wait [#allocation3], 128  }
   0xc   :  { %480 = vsyncadd [#allocation3], 4294967168 }
   0xd   :  { %481 = dma.done.wait [#allocation6], 2048  }
   0xe   :  { %482 = vsyncadd [#allocation6], 4294965248  ;;  %v364_v0 = vld [vmem:[#allocation5 + $0x38] sm:$0xff]  ;;  %v363_v1 = vld [vmem:[#allocation5 + $0x30] sm:$0xff]  ;;  %s490_s11 = smov [#allocation8]   ;;  %s491_s15 = smov 128  }
   0xf   :  { %144 = vmatpush.bf16.msra.mxu0 %v364_v0  ;;  %v372_v2 = vld [vmem:[#allocation7 + $0x38] sm:$0xff]  ;;  %v371_v3 = vld [vmem:[#allocation7 + $0x30] sm:$0xff]  ;;  %v362_v4 = vld [vmem:[#allocation5 + $0x28] sm:$0xff]  ;;  %s272_s12 = sshll.u32 %s490_s11, 4  ;;  %s492_s16 = smov 8   ;;  %s273_s12 = int_to_ptr.vmem [resolvable:$true] %s272_s12 }
  0x10   :  { %225 = vmatpush.bf16.msra.mxu1 %v372_v2  ;;  %v370_v5 = vld [vmem:[#allocation7 + $0x28] sm:$0xff]  ;;  %v361_v6 = vld [vmem:[#allocation5 + $0x20] sm:$0xff]  ;;  %v360_v8 = vld [vmem:[#allocation5 + $0x18] sm:$0xff] }
  0x11   :  { %v369_v7 = vld [vmem:[#allocation7 + $0x20] sm:$0xff]  ;;  %v359_v9 = vld [vmem:[#allocation5 + $0x10] sm:$0xff]  ;;  %v358_v10 = vld [vmem:[#allocation5 + $0x8] sm:$0xff] }
  0x12   :  { %v357_v11 = vld [vmem:[#allocation5] sm:$0xff]  ;;  %v356_v12 = vld [vmem:[#allocation2] sm:$0xff]  ;;  %v367_v14 = vld [vmem:[#allocation7 + $0x10] sm:$0xff] }
  0x13   :  { %145 = vmatpush.bf16.msra.mxu0 %v363_v1  ;;  %v368_v13 = vld [vmem:[#allocation7 + $0x18] sm:$0xff]  ;;  %v366_v15 = vld [vmem:[#allocation7 + $0x8] sm:$0xff]  ;;  %v365_v16 = vld [vmem:[#allocation7] sm:$0xff] }
  0x14   :  { %226 = vmatpush.bf16.msra.mxu1 %v371_v3  ;;  %v381_v18 = vld [vmem:[%s543_s2] ss:$0 sm:$0xff]  ;;  %s274_s2 = sshll.u32 %s546_s5, 4  ;;  %s275_s2 = int_to_ptr.hbm [resolvable:$true] %s274_s2 }
  0x15   :  { %v382_v25 = vld [vmem:[%s545_s4] ss:$0 sm:$0xff] }
  0x17   :  { %146 = vmatpush.bf16.msra.mxu0 %v362_v4 }
  0x18   :  { %227 = vmatpush.bf16.msra.mxu1 %v370_v5 }
  0x1b   :  { %147 = vmatpush.bf16.msra.mxu0 %v361_v6 }
  0x1c   :  { %228 = vmatpush.bf16.msra.mxu1 %v369_v7 }
  0x1f   :  { %148 = vmatpush.bf16.msra.mxu0 %v360_v8 }
  0x20   :  { %229 = vmatpush.bf16.msra.mxu1 %v368_v13 }
  0x23   :  { %149 = vmatpush.bf16.msra.mxu0 %v359_v9 }
  0x24   :  { %230 = vmatpush.bf16.msra.mxu1 %v367_v14 }
  0x27   :  { %150 = vmatpush.bf16.msra.mxu0 %v358_v10 }
  0x28   :  { %231 = vmatpush.bf16.msra.mxu1 %v366_v15 }
  0x2b   :  { %151 = vmatpush.bf16.msra.mxu0 %v357_v11 }
  0x2c   :  { %232 = vmatpush.bf16.msra.mxu1 %v365_v16 }
  0x2e   :  { %152 = vmatmul.bf16.vlgmr.msra.gmra.mxu0 %v356_v12 }
  0xab   :  { %v153_v17 = vpop.f32.mrf.mxu0 }
  0xac   :  { %v154_v19 = vadd.f32 %v381_v18, %v153_v17 }
  0xae   :  { %v158_v22 = vmax.f32 %v154_v19, 0.0 }
  0xb3   :  { %v155_v20 = vpop.f32.mrf.mxu0 }
  0xb4   :  { %v156_v21 = vadd.f32 %v381_v18, %v155_v20 }
  0xb6   :  { %v159_v23 = vmax.f32 %v156_v21, 0.0 }
  0xb8   :  { %v160_v24 = vpack.c.bf16 %v159_v23, %v158_v22 }
  0xba   :  { %233 = vmatmul.bf16.vlgmr.msra.gmra.mxu1 %v160_v24 }
 0x137   :  { %v234_v26 = vpop.f32.mrf.mxu1 }
 0x138   :  { %v264_v27 = vadd.f32 %v382_v25, %v234_v26 }
 0x13a   :  { %266 = vst [vmem:[#allocation8] sm:$0xff] %v264_v27 }
 0x13f   :  { %v236_v28 = vpop.f32.mrf.mxu1 }
 0x140   :  { %v265_v29 = vadd.f32 %v382_v25, %v236_v28 }
 0x142   :  { %267 = vst [vmem:[#allocation8 + $0x8] sm:$0xff] %v265_v29 }
 0x143   :  { %280 = dma.vmem_to_hbm [thread:$0]  %s273_s12, 256, %s275_s2, [#allocation4], %s491_s15, %s491_s15, %s492_s16  }
 0x144   :  { %483 = dma.done.wait [#allocation4], 256  }
 0x145   :  { %484 = vsyncadd [#allocation4], 4294967040 }
 0x146   :  { %285 = vsyncpa [#allocation3], 1 }
 0x147   :  { %286 = vsyncpa [#allocation6], 1 }
 0x148   :  { %287 = vsyncpa [#allocation4], 1 }

</bundles_post_ra>
